<compile_context>
chip_gen: v7x
topology: tpu7x:2x2x1
jax: 0.10.0
libtpu: 0.0.40
codegen_flags: <defaults>
</compile_context>

<pallas_src>
import jax
import jax.numpy as jnp
from jax.experimental import pallas as pl
from jax.experimental.pallas import tpu as pltpu


def _conv_output_size(spectra_size, kernel_size, stride, padding=0):
    return int((spectra_size - kernel_size + 2 * padding) / stride + 1)


def _add_pos_kernel(x_ref, pos_ref, o_ref):
    # Mem-bound broadcast add.  pos stays in its parameter dtype (f32); the
    # add promotes and the store casts back to the activation dtype, so the
    # cast rides the VPU slot for free under the DMA-bound pipeline.
    o_ref[...] = (x_ref[...] + pos_ref[...]).astype(o_ref.dtype)


def _sublane_multiple(itemsize):
    # Native sublane packing: f32 -> 8, bf16 -> 16, int8/fp8 -> 32 rows.
    return {4: 8, 2: 16, 1: 32}.get(itemsize, 8)


def _choose_3d_tiles(B, S, D, itemsize, max_block_bytes):
    """Budget-safe (tb, ts, td) block dims for x of shape (B, S, D).

    Each block dim is either the full extent (always legal) or
    (sublane, 128)-aligned; the grid uses pl.cdiv so the dims need not divide
    evenly (Pallas masks partial edge blocks).  The per-block footprint stays
    (approximately) within `max_block_bytes`.
    """
    sub = _sublane_multiple(itemsize)
    max_elems = max(max_block_bytes // itemsize, sub * 128)

    # Lane (last) dim: keep full D only if a minimal sub-row slab still fits
    # the budget; otherwise the largest 128-multiple that does.
    if D * min(S, sub) <= max_elems:
        td = D
    else:
        td = max(((max_elems // min(S, sub)) // 128) * 128, 128)

    # Sublane (second-to-last) dim: full S, or a sublane-aligned cap.
    rows_budget = max(max_elems // td, 1)
    if S <= rows_budget:
        ts = S
    else:
        ts = max((rows_budget // sub) * sub, sub)

    # Batch (leading) dim: no alignment constraint; fill remaining budget.
    tb = max(min(B, max_elems // (ts * td)), 1)
    return tb, ts, td


def abs_pos_embedding(x, pos_embedding, *, max_block_bytes=6 * 1024 * 1024):
    """x: (B, S, D); pos_embedding: (1, S, D). Returns x + pos_embedding."""
    B, S, D = x.shape
    assert pos_embedding.shape == (1, S, D)

    x_isz = jnp.dtype(x.dtype).itemsize
    p_isz = jnp.dtype(pos_embedding.dtype).itemsize
    total_bytes = B * S * D * x_isz

    cost = pl.CostEstimate(
        flops=B * S * D,
        transcendentals=0,
        bytes_accessed=2 * B * S * D * x_isz + S * D * p_isz,
    )
    # 48 MiB scoped VMEM: comfortably above the ~36 MiB worst-case
    # double-buffered footprint of 6 MiB blocks, comfortably below v7x's
    # 64 MiB physical VMEM (v5e/v6e have 128 MiB).
    vmem_limit = 48 * 1024 * 1024

    if total_bytes <= max_block_bytes:
        # Small problem: flatten (S, D) into one lane-dense axis and do the
        # whole broadcast-add in a single grid step (full-extent blocks, so
        # no (8,128) divisibility requirement).  For truly tiny shapes plain
        # XLA `x + pos` would be equally fast; kept as a pallas_call so the
        # kernel path is what runs.
        N = S * D
        out2 = pl.pallas_call(
            _add_pos_kernel,
            out_shape=jax.ShapeDtypeStruct((B, N), x.dtype),
            grid_spec=pltpu.PrefetchScalarGridSpec(
                num_scalar_prefetch=0,
                grid=(1,),
                in_specs=[
                    pl.BlockSpec((B, N), lambda i: (0, 0)),
                    pl.BlockSpec((1, N), lambda i: (0, 0)),
                ],
                out_specs=pl.BlockSpec((B, N), lambda i: (0, 0)),
            ),
            compiler_params=pltpu.CompilerParams(
                dimension_semantics=("arbitrary",),
                vmem_limit_bytes=vmem_limit,
            ),
            cost_estimate=cost,
        )(x.reshape(B, N), pos_embedding.reshape(1, N))
        return out2.reshape(B, S, D)

    # Large problem: tile (B, S, D) with a cdiv grid (edge blocks masked).
    # Batch axis is innermost so the pos tile index is unchanged across
    # consecutive steps and Pallas does not re-DMA it per batch block.
    tb, ts, td = _choose_3d_tiles(B, S, D, x_isz, max_block_bytes)
    grid = (pl.cdiv(S, ts), pl.cdiv(D, td), pl.cdiv(B, tb))
    return pl.pallas_call(
        _add_pos_kernel,
        out_shape=jax.ShapeDtypeStruct((B, S, D), x.dtype),
        grid_spec=pltpu.PrefetchScalarGridSpec(
            num_scalar_prefetch=0,
            grid=grid,
            in_specs=[
                pl.BlockSpec((tb, ts, td), lambda s, d, b: (b, s, d)),
                pl.BlockSpec((1, ts, td), lambda s, d, b: (0, s, d)),
            ],
            out_specs=pl.BlockSpec((tb, ts, td), lambda s, d, b: (b, s, d)),
        ),
        compiler_params=pltpu.CompilerParams(
            dimension_semantics=("parallel", "parallel", "parallel"),
            vmem_limit_bytes=vmem_limit,
        ),
        cost_estimate=cost,
    )(x, pos_embedding)


class AbsPosEmbeddingPallas:
    """Mirrors the PyTorch AbsPosEmbedding module (forward: x + pos)."""

    def __init__(self, spectra_size, patch_size, dim, stride=None, cls=True, key=None):
        if not spectra_size % patch_size == 0:
            raise Exception("Spectra dimensions must be divisible by the patch size!")
        stride = patch_size if stride is None else stride
        output_size = _conv_output_size(spectra_size, patch_size, stride)
        num_patches = output_size * 1
        self.seq_len = num_patches + int(cls)
        self.dim = dim
        if key is None:
            key = jax.random.PRNGKey(0)
        # randn(1, num_patches + cls, dim) * 0.02, kept in f32 like the torch
        # Parameter; the kernel adds in f32 and casts on store.
        self.pos_embedding = (
            jax.random.normal(key, (1, self.seq_len, dim), dtype=jnp.float32) * 0.02
        )

    def __call__(self, x):
        return abs_pos_embedding(x, self.pos_embedding)


if __name__ == "__main__":
    key = jax.random.PRNGKey(0)
    k_param, k_x, k_t, k_bf = jax.random.split(key, 4)

    # --- Small demo (single-block path) ---------------------------------
    # spectra_size=16, patch_size=4 -> num_patches=4, cls=True -> S=5
    spectra_size, patch_size, dim, batch = 16, 4, 32, 2
    module = AbsPosEmbeddingPallas(spectra_size, patch_size, dim, key=k_param)
    x = jax.random.normal(k_x, (batch, module.seq_len, dim), dtype=jnp.float32)

    out = jax.block_until_ready(module(x))
    ref = x + module.pos_embedding
    assert out.shape == (batch, module.seq_len, dim)
    assert jnp.allclose(out, ref, atol=1e-6), "mismatch vs reference (small path)"

    # --- Tiled path with cdiv edge blocks (forced via a small budget so the
    # test stays at small shapes) -----------------------------------------
    Bt, St, Dt = 4, 136, 200
    xt = jax.random.normal(k_t, (Bt, St, Dt), dtype=jnp.float32)
    post = jax.random.normal(k_param, (1, St, Dt), dtype=jnp.float32) * 0.02
    outt = jax.block_until_ready(
        abs_pos_embedding(xt, post, max_block_bytes=64 * 1024)
    )
    assert jnp.allclose(outt, xt + post, atol=1e-6), "mismatch vs reference (tiled path)"

    # --- bf16 activations + f32 parameter: in-kernel promote/add/cast ----
    xb = jax.random.normal(k_bf, (batch, module.seq_len, dim), dtype=jnp.bfloat16)
    outb = jax.block_until_ready(module(xb))
    refb = (xb.astype(jnp.float32) + module.pos_embedding).astype(jnp.bfloat16)
    assert outb.dtype == jnp.bfloat16
    assert jnp.allclose(
        outb.astype(jnp.float32), refb.astype(jnp.float32), atol=1e-2
    ), "mismatch vs reference (bf16 path)"

    print("KERNEL_OK")
</pallas_src>

<mosaic_0001>
module attributes {stable_mosaic.version = 11 : i64} {
  func.func @_add_pos_kernel(%arg0: i32, %arg1: memref<2x160xf32, #tpu.memory_space<vmem>>, %arg2: memref<1x160xf32, #tpu.memory_space<vmem>>, %arg3: memref<2x160xf32, #tpu.memory_space<vmem>>) attributes {dimension_semantics = [#tpu.dimension_semantics<arbitrary>], iteration_bounds = array<i64: 1>, scalar_prefetch = 0 : i64, scratch_operands = 0 : i64, tpu.core_type = #tpu.core_type<tc>, window_params = [{pipeline_mode = #tpu.pipeline_mode<synchronous>, transform_indices = @transform_0, window_bounds = array<i64: 2, 160>}, {pipeline_mode = #tpu.pipeline_mode<synchronous>, transform_indices = @transform_1, window_bounds = array<i64: 1, 160>}, {pipeline_mode = #tpu.pipeline_mode<synchronous>, transform_indices = @transform_2, window_bounds = array<i64: 2, 160>}]} {
    %c0 = arith.constant 0 : index
    %c0_0 = arith.constant 0 : index
    %0 = vector.load %arg1[%c0, %c0_0] : memref<2x160xf32, #tpu.memory_space<vmem>>, vector<2x160xf32>
    %c0_1 = arith.constant 0 : index
    %c0_2 = arith.constant 0 : index
    %1 = vector.load %arg2[%c0_1, %c0_2] : memref<1x160xf32, #tpu.memory_space<vmem>>, vector<1x160xf32>
    %2 = vector.broadcast %1 : vector<1x160xf32> to vector<2x160xf32>
    %3 = arith.addf %0, %2 : vector<2x160xf32>
    %c0_3 = arith.constant 0 : index
    %c0_4 = arith.constant 0 : index
    %4 = vector.load %arg3[%c0_3, %c0_4] : memref<2x160xf32, #tpu.memory_space<vmem>>, vector<2x160xf32>
    tpu.vector_store %arg3[%c0_3, %c0_4], %3 {strides = array<i32>} : memref<2x160xf32, #tpu.memory_space<vmem>>, vector<2x160xf32>,
    return
  }
  func.func @transform_0(%arg0: i32) -> (i32, i32) {
    %c0_i32 = arith.constant 0 : i32
    %c0_i32_0 = arith.constant 0 : i32
    %c0_i32_1 = arith.constant 0 : i32
    return %c0_i32, %c0_i32_0 : i32, i32
  }
  func.func @transform_1(%arg0: i32) -> (i32, i32) {
    %c0_i32 = arith.constant 0 : i32
    %c0_i32_0 = arith.constant 0 : i32
    %c0_i32_1 = arith.constant 0 : i32
    return %c0_i32, %c0_i32_0 : i32, i32
  }
  func.func @transform_2(%arg0: i32) -> (i32, i32) {
    %c0_i32 = arith.constant 0 : i32
    %c0_i32_0 = arith.constant 0 : i32
    %c0_i32_1 = arith.constant 0 : i32
    return %c0_i32, %c0_i32_0 : i32, i32
  }
}

</mosaic_0001>

<bundles_post_ra>
// kernel: tpu_custom_call.1
= control target key start
LH: loop header
LB: loop body
LE: loop exit
PB: predicated region body
PF: predicated region fallthrough
CT: control target
= control target key end

     0   :  { %7 = vsyncpa [#allocation3], 0  ;;  %s160_s0 = inlined_call_operand.hbm [shape: f32[2,160], index: 0, kind: input, shape index: {}]   ;;  %s161_s1 = inlined_call_operand.vmem [shape: f32[1,160], index: 1, kind: input, shape index: {}]   ;;  %s162_s2 = inlined_call_operand.hbm [shape: f32[2,160], index: 2, kind: output, shape index: {}]  }
   0x1   :  { %8 = vsyncpa [#allocation4], 0  ;;  %s115_s9 = smov [#allocation2]   ;;  %s67_s13 = scalar_lea.hbm %s160_s0, 64 }
   0x2   :  { %s15_s10 = sshll.u32 %s115_s9, 4  ;;  %p68_p0 = scmp.ne.s32.totalorder %s160_s0, %s67_s13  ;;  %s16_s10 = int_to_ptr.vmem [resolvable:$true] %s15_s10 }
   0x3   :  { %p71_p1 = scmp.lt.u32.totalorder %s67_s13, %s160_s0 }
   0x5   :  { %p73_p2 = pnand %p71_p1, %p68_p0 }
   0x7   :  { %76 = shalt.err (!%p73_p2)
}
   0x8   :  { %s77_s18 = scalar_lea.vmem %s16_s10, 64  ;;  %p82_p4 = scmp.lt.s32.totalorder %s16_s10, %s16_s10 }
   0x9   :  { %p78_p3 = scmp.ne.s32.totalorder %s16_s10, %s77_s18  ;;  %p83_p5 = scmp.lt.s32.totalorder %s77_s18, %s77_s18 }
   0xb   :  { %p84_p6 = por %p83_p5, %p82_p4 }
   0xd   :  { %p85_p7 = pnand %p84_p6, %p78_p3 }
   0xf   :  { %88 = shalt.err (!%p85_p7)
}
  0x10   :  { %18 = dma.hbm_to_vmem [thread:$0]  %s160_s0, 64, %s16_s10, [#allocation3]  }
  0x11   :  { %111 = dma.done.wait [#allocation3], 64  }
  0x12   :  { %112 = vsyncadd [#allocation3], 4294967232  ;;  %v27_v0 = vlaneseq  ;;  %v116_v1 = vmov 1983009808   ;;  %v25_v7 = vld [vmem:[%s161_s1] sm:$0x3] }
  0x13   :  { %v37_v2 = vunpack.c.l.s4 %v116_v1  ;;  %vm45_vm0 = vcmask 1041408   ;;  %vm46_vm1 = vcmask 257026   ;;  %v24_v12 = vld [vmem:[#allocation2] sm:$0xf]  ;;  %s117_s0 = smov [#allocation5]  }
  0x14   :  { %v28_v3 = vshrl.u32 %v27_v0, 7  ;;  %s55_s23 = sshll.u32 %s117_s0, 4  ;;  %vm47_vm2 = vmor %vm46_vm1, %vm45_vm0  ;;  %s56_s23 = int_to_ptr.vmem [resolvable:$true] %s55_s23 }
  0x15   :  { %v38_v6 = vunpack.c.0.s8 %v37_v2  ;;  %s89_s24 = scalar_lea.vmem %s56_s23, 64  ;;  %p94_p9 = scmp.lt.s32.totalorder %s56_s23, %s56_s23 }
  0x16   :  { %v29_v4 = vsub.s32 0, %v28_v3  ;;  %v33_v5 = vsub.s32 1, %v28_v3  ;;  %p90_p8 = scmp.ne.s32.totalorder %s56_s23, %s89_s24  ;;  %p95_p10 = scmp.lt.s32.totalorder %s89_s24, %s89_s24 }
  0x17   :  { %v41_v10 = vsub.s32 %v38_v6, %v28_v3 }
  0x18   :  { %v30_v8 = vrot.slane %v25_v7, %v29_v4  ;;  %v34_v9 = vrot.slane %v25_v7, %v33_v5  ;;  %p96_p11 = por %p95_p10, %p94_p9 }
  0x1a   :  { %v35_v11 = vcombine.low %v30_v8, %v34_v9  ;;  %p97_p12 = pnand %p96_p11, %p90_p8 }
  0x1c   :  { %v42_v13 = vrot.slane %v35_v11, %v41_v10 }
  0x1e   :  { %v44_v14 = vadd.f32 %v42_v13, %v24_v12 }
  0x20   :  { %48 = vst.msk [vmem:[#allocation5] sm:$0xf] %vm47_vm2, %v44_v14 }
  0x21   :  { %100 = shalt.err (!%p97_p12)
}
  0x22   :  { %s101_s26 = scalar_lea.hbm %s162_s2, 64 }
  0x23   :  { %p102_p13 = scmp.ne.s32.totalorder %s162_s2, %s101_s26  ;;  %p105_p0 = scmp.lt.u32.totalorder %s101_s26, %s162_s2 }
  0x25   :  { %p107_p1 = pnand %p105_p0, %p102_p13 }
  0x27   :  { %110 = shalt.err (!%p107_p1)
}
  0x28   :  { %58 = dma.vmem_to_hbm [thread:$0]  %s56_s23, 64, %s162_s2, [#allocation4]  }
  0x29   :  { %113 = dma.done.wait [#allocation4], 64  }
  0x2a   :  { %114 = vsyncadd [#allocation4], 4294967232 }
  0x2b   :  { %62 = vsyncpa [#allocation3], 1 }
  0x2c   :  { %63 = vsyncpa [#allocation4], 1 }

</bundles_post_ra>
